<compile_context>
chip_gen: v6e
topology: v6e:2x2x1
jax: 0.10.0
libtpu: 0.0.40
codegen_flags: <defaults>
</compile_context>

<pallas_src>
import functools

import jax
import jax.numpy as jnp
from jax import lax
from jax.experimental import pallas as pl
from jax.experimental.pallas import tpu as pltpu


def _pool_matrix(T, T_out, kernel_size, stride):
    """(T, T_out) matrix with 1/K in each pooling window; built in-register."""
    t_idx = lax.broadcasted_iota(jnp.int32, (T, T_out), 0)
    o_idx = lax.broadcasted_iota(jnp.int32, (T, T_out), 1)
    start = o_idx * stride
    in_win = (t_idx >= start) & (t_idx < start + kernel_size)
    return jnp.where(in_win, 1.0 / kernel_size, 0.0).astype(jnp.float32)


def _frame_avg_pool_kernel(x_ref, w_ref, b_ref, o_ref, *scratch, T, T_out,
                           kernel_size, stride, bb, n_k):
    # x_ref  : (bb, cin_blk, T)   batch slab, Cin slab (native NCW)
    # w_ref  : (H, cin_blk)       1x1 conv weight slab
    # b_ref  : (H, 1)             conv bias (f32)
    # o_ref  : (bb, H, T_out)     NCW output block
    # scratch: [(bb, H, T) f32]   conv accumulator, only when n_k > 1
    w = w_ref[...]
    bias = b_ref[...]

    if n_k == 1:
        # Single contraction block: compute, fuse bias+ReLU+pool, store.
        pmat = _pool_matrix(T, T_out, kernel_size, stride)
        for i in range(bb):
            h = jnp.maximum(
                jnp.dot(w, x_ref[i], preferred_element_type=jnp.float32) + bias,
                0.0)                                             # (H, T) f32
            o_ref[i] = jnp.dot(h, pmat,
                               preferred_element_type=jnp.float32
                               ).astype(o_ref.dtype)
    else:
        acc_ref = scratch[0]
        k = pl.program_id(1)

        @pl.when(k == 0)
        def _():
            acc_ref[...] = jnp.zeros_like(acc_ref)

        for i in range(bb):
            acc_ref[i] += jnp.dot(w, x_ref[i],
                                  preferred_element_type=jnp.float32)

        @pl.when(k == pl.num_programs(1) - 1)
        def _():
            pmat = _pool_matrix(T, T_out, kernel_size, stride)
            for i in range(bb):
                h = jnp.maximum(acc_ref[i] + bias, 0.0)          # (H, T) f32
                o_ref[i] = jnp.dot(h, pmat,
                                   preferred_element_type=jnp.float32
                                   ).astype(o_ref.dtype)


def _choose_blocks(B, Cin, T, H, T_out, itemsize, budget_bytes):
    """Pick (batch_block, cin_block) under a VMEM budget."""
    def vmem_bytes(bb, cb, with_acc):
        return (2 * bb * cb * T * itemsize          # x (double-buffered)
                + 2 * H * cb * itemsize             # W (double-buffered)
                + 2 * H * 4                         # bias
                + 2 * bb * H * T_out * 4            # out (double-buffered)
                + (bb * H * T * 4 if with_acc else 0))

    # Prefer a full-Cin block (weight is DMA'd from HBM exactly once) and as
    # many batch elements per step as fit (amortizes per-step overhead).
    bb_cands = [d for d in range(min(B, 8), 0, -1) if B % d == 0]
    for bb in bb_cands:
        if vmem_bytes(bb, Cin, with_acc=False) <= budget_bytes:
            return bb, Cin
    # Fallback: one batch element per step, tile the contraction axis
    # (requires the f32 accumulator; weight is re-streamed per batch element).
    cb = (Cin // 128) * 128
    while cb >= 128:
        if Cin % cb == 0 and vmem_bytes(1, cb, with_acc=True) <= budget_bytes:
            return 1, cb
        cb -= 128
    return 1, Cin


def frame_avg_pool(x, weight, bias, kernel_size, stride, *,
                   compute_dtype=jnp.float32):
    """x: (B, Cin, T); weight: (H, Cin, 1); bias: (H,). Returns (B, H, T_out)."""
    B, Cin, T = x.shape
    H = weight.shape[0]
    assert kernel_size <= T, "AvgPool1d window larger than sequence length"
    T_out = (T - kernel_size) // stride + 1
    assert T_out >= 1

    w2d = weight[:, :, 0].astype(compute_dtype)       # (H, Cin), no transpose
    b2d = bias.reshape(H, 1).astype(jnp.float32)      # (H, 1), f32 epilogue
    x_in = x.astype(compute_dtype)                    # native NCW, no transpose

    itemsize = jnp.dtype(compute_dtype).itemsize
    vmem_limit = 48 * 1024 * 1024                     # safe on v7x (64 MiB/TC)
    budget = 40 * 1024 * 1024
    bb, cin_blk = _choose_blocks(B, Cin, T, H, T_out, itemsize, budget)
    n_b = B // bb
    n_k = Cin // cin_blk

    kernel = functools.partial(_frame_avg_pool_kernel, T=T, T_out=T_out,
                               kernel_size=kernel_size, stride=stride,
                               bb=bb, n_k=n_k)

    w_reads = 1 if n_k == 1 else n_b
    cost = pl.CostEstimate(
        flops=2 * B * H * Cin * T + 2 * B * H * T * T_out,
        transcendentals=0,
        bytes_accessed=(B * Cin * T + w_reads * H * Cin) * itemsize
                       + H * 4 + B * H * T_out * 4)

    scratch = [pltpu.VMEM((bb, H, T), jnp.float32)] if n_k > 1 else []

    out = pl.pallas_call(
        kernel,
        out_shape=jax.ShapeDtypeStruct((B, H, T_out), jnp.float32),
        grid_spec=pltpu.PrefetchScalarGridSpec(
            num_scalar_prefetch=0,
            grid=(n_b, n_k),                               # reduction axis last
            in_specs=[
                pl.BlockSpec((bb, cin_blk, T), lambda b, k: (b, k, 0)),
                pl.BlockSpec((H, cin_blk), lambda b, k: (0, k)),
                pl.BlockSpec((H, 1), lambda b, k: (0, 0)),
            ],
            out_specs=pl.BlockSpec((bb, H, T_out), lambda b, k: (b, 0, 0)),
            scratch_shapes=scratch,
        ),
        compiler_params=pltpu.CompilerParams(
            dimension_semantics=("parallel", "arbitrary"),
            vmem_limit_bytes=vmem_limit),
        cost_estimate=cost,
    )(x_in, w2d, b2d)

    return out   # (B, H, T_out) NCW -- matches the PyTorch module's output


def _reference(x, weight, bias, kernel_size, stride):
    """Pure-JAX reference matching the PyTorch module."""
    B, Cin, T = x.shape
    T_out = (T - kernel_size) // stride + 1
    h = jnp.einsum("bct,hc->bht", x, weight[:, :, 0],
                   precision=jax.lax.Precision.HIGHEST) + bias[None, :, None]
    h = jnp.maximum(h, 0.0)
    windows = [h[:, :, o * stride:o * stride + kernel_size].mean(axis=-1)
               for o in range(T_out)]
    return jnp.stack(windows, axis=-1)  # (B, H, T_out)


if __name__ == "__main__":
    # Synthetic config (cfg.INPUT_SIZE, cfg.HIDDEN_SIZE, cfg.KERNEL_SIZE, cfg.STRIDE)
    B, INPUT_SIZE, HIDDEN_SIZE, T = 2, 32, 32, 16
    KERNEL_SIZE, STRIDE = 4, 4

    key = jax.random.PRNGKey(0)
    kx, kw, kb = jax.random.split(key, 3)
    x = jax.random.normal(kx, (B, INPUT_SIZE, T), dtype=jnp.float32)            # NCW like PyTorch
    weight = jax.random.normal(kw, (HIDDEN_SIZE, INPUT_SIZE, 1), dtype=jnp.float32) * 0.1
    bias = jax.random.normal(kb, (HIDDEN_SIZE,), dtype=jnp.float32) * 0.1

    out = frame_avg_pool(x, weight, bias, KERNEL_SIZE, STRIDE)
    out = jax.block_until_ready(out)

    ref = _reference(x, weight, bias, KERNEL_SIZE, STRIDE)
    T_OUT = (T - KERNEL_SIZE) // STRIDE + 1
    assert out.shape == (B, HIDDEN_SIZE, T_OUT), out.shape
    assert jnp.allclose(out, ref, atol=1e-4, rtol=1e-4), float(jnp.max(jnp.abs(out - ref)))

    print("KERNEL_OK")
</pallas_src>

<mosaic_0001>
module attributes {stable_mosaic.version = 11 : i64} {
  func.func @_frame_avg_pool_kernel(%arg0: i32, %arg1: i32, %arg2: memref<2x32x16xf32, #tpu.memory_space<vmem>>, %arg3: memref<32x32xf32, #tpu.memory_space<vmem>>, %arg4: memref<32x1xf32, #tpu.memory_space<vmem>>, %arg5: memref<2x32x4xf32, #tpu.memory_space<vmem>>) attributes {dimension_semantics = [#tpu.dimension_semantics<parallel>, #tpu.dimension_semantics<arbitrary>], iteration_bounds = array<i64: 1, 1>, scalar_prefetch = 0 : i64, scratch_operands = 0 : i64, tpu.core_type = #tpu.core_type<tc>, window_params = [{transform_indices = @transform_0, window_bounds = array<i64: 2, 32, 16>}, {transform_indices = @transform_1, window_bounds = array<i64: 32, 32>}, {pipeline_mode = #tpu.pipeline_mode<synchronous>, transform_indices = @transform_2, window_bounds = array<i64: 32, 1>}, {transform_indices = @transform_3, window_bounds = array<i64: 2, 32, 4>}]} {
    %c0 = arith.constant 0 : index
    %c0_0 = arith.constant 0 : index
    %0 = vector.load %arg3[%c0, %c0_0] : memref<32x32xf32, #tpu.memory_space<vmem>>, vector<32x32xf32>
    %c0_1 = arith.constant 0 : index
    %c0_2 = arith.constant 0 : index
    %1 = vector.load %arg4[%c0_1, %c0_2] : memref<32x1xf32, #tpu.memory_space<vmem>>, vector<32x1xf32>
    %2 = tpu.iota {dimensions = array<i32: 0>} : vector<16x4xi32>
    %3 = tpu.iota {dimensions = array<i32: 1>} : vector<16x4xi32>
    %c4_i32 = arith.constant 4 : i32
    %4 = vector.broadcast %c4_i32 : i32 to vector<16x4xi32>
    %5 = arith.muli %3, %4 : vector<16x4xi32>
    %6 = arith.cmpi sge, %2, %5 : vector<16x4xi32>
    %c4_i32_3 = arith.constant 4 : i32
    %7 = vector.broadcast %c4_i32_3 : i32 to vector<16x4xi32>
    %8 = arith.addi %5, %7 : vector<16x4xi32>
    %9 = arith.cmpi slt, %2, %8 : vector<16x4xi32>
    %10 = arith.andi %6, %9 : vector<16x4xi1>
    %cst = arith.constant 2.500000e-01 : f32
    %cst_4 = arith.constant 0.000000e+00 : f32
    %11 = vector.broadcast %cst : f32 to vector<16x4xf32>
    %12 = vector.broadcast %cst_4 : f32 to vector<16x4xf32>
    %13 = arith.select %10, %11, %12 : vector<16x4xi1>, vector<16x4xf32>
    %c0_5 = arith.constant 0 : index
    %c0_6 = arith.constant 0 : index
    %c0_7 = arith.constant 0 : index
    %14 = vector.load %arg2[%c0_5, %c0_6, %c0_7] : memref<2x32x16xf32, #tpu.memory_space<vmem>>, vector<1x32x16xf32>
    %15 = vector.shape_cast %14 : vector<1x32x16xf32> to vector<32x16xf32>
    %cst_8 = arith.constant dense<0.000000e+00> : vector<32x16xf32>
    %16 = tpu.matmul %0, %15, %cst_8 {dimension_numbers = #tpu.dot_dimension_numbers<[1], [0], [0], [1], [0, 0, 1, 1], [], []>} : vector<32x32xf32>, vector<32x16xf32>, vector<32x16xf32> -> vector<32x16xf32>
    %17 = vector.broadcast %1 : vector<32x1xf32> to vector<32x16xf32>
    %18 = arith.addf %16, %17 : vector<32x16xf32>
    %cst_9 = arith.constant 0.000000e+00 : f32
    %19 = vector.broadcast %cst_9 : f32 to vector<32x16xf32>
    %20 = arith.maximumf %18, %19 : vector<32x16xf32>
    %cst_10 = arith.constant dense<0.000000e+00> : vector<32x4xf32>
    %21 = tpu.matmul %20, %13, %cst_10 {dimension_numbers = #tpu.dot_dimension_numbers<[1], [0], [0], [1], [0, 0, 1, 1], [], []>} : vector<32x16xf32>, vector<16x4xf32>, vector<32x4xf32> -> vector<32x4xf32>
    %c0_11 = arith.constant 0 : index
    %c0_12 = arith.constant 0 : index
    %c0_13 = arith.constant 0 : index
    %22 = vector.load %arg5[%c0_11, %c0_12, %c0_13] : memref<2x32x4xf32, #tpu.memory_space<vmem>>, vector<1x32x4xf32>
    %23 = vector.shape_cast %22 : vector<1x32x4xf32> to vector<32x4xf32>
    %24 = vector.shape_cast %21 : vector<32x4xf32> to vector<1x32x4xf32>
    tpu.vector_store %arg5[%c0_11, %c0_12, %c0_13], %24 {strides = array<i32>} : memref<2x32x4xf32, #tpu.memory_space<vmem>>, vector<1x32x4xf32>,
    %c1 = arith.constant 1 : index
    %c0_14 = arith.constant 0 : index
    %c0_15 = arith.constant 0 : index
    %25 = vector.load %arg2[%c1, %c0_14, %c0_15] : memref<2x32x16xf32, #tpu.memory_space<vmem>>, vector<1x32x16xf32>
    %26 = vector.shape_cast %25 : vector<1x32x16xf32> to vector<32x16xf32>
    %cst_16 = arith.constant dense<0.000000e+00> : vector<32x16xf32>
    %27 = tpu.matmul %0, %26, %cst_16 {dimension_numbers = #tpu.dot_dimension_numbers<[1], [0], [0], [1], [0, 0, 1, 1], [], []>} : vector<32x32xf32>, vector<32x16xf32>, vector<32x16xf32> -> vector<32x16xf32>
    %28 = vector.broadcast %1 : vector<32x1xf32> to vector<32x16xf32>
    %29 = arith.addf %27, %28 : vector<32x16xf32>
    %cst_17 = arith.constant 0.000000e+00 : f32
    %30 = vector.broadcast %cst_17 : f32 to vector<32x16xf32>
    %31 = arith.maximumf %29, %30 : vector<32x16xf32>
    %cst_18 = arith.constant dense<0.000000e+00> : vector<32x4xf32>
    %32 = tpu.matmul %31, %13, %cst_18 {dimension_numbers = #tpu.dot_dimension_numbers<[1], [0], [0], [1], [0, 0, 1, 1], [], []>} : vector<32x16xf32>, vector<16x4xf32>, vector<32x4xf32> -> vector<32x4xf32>
    %c1_19 = arith.constant 1 : index
    %c0_20 = arith.constant 0 : index
    %c0_21 = arith.constant 0 : index
    %33 = vector.load %arg5[%c1_19, %c0_20, %c0_21] : memref<2x32x4xf32, #tpu.memory_space<vmem>>, vector<1x32x4xf32>
    %34 = vector.shape_cast %33 : vector<1x32x4xf32> to vector<32x4xf32>
    %35 = vector.shape_cast %32 : vector<32x4xf32> to vector<1x32x4xf32>
    tpu.vector_store %arg5[%c1_19, %c0_20, %c0_21], %35 {strides = array<i32>} : memref<2x32x4xf32, #tpu.memory_space<vmem>>, vector<1x32x4xf32>,
    return
  }
  func.func @transform_0(%arg0: i32, %arg1: i32) -> (i32, i32, i32) {
    %c0_i32 = arith.constant 0 : i32
    %c0_i32_0 = arith.constant 0 : i32
    return %arg0, %arg1, %c0_i32 : i32, i32, i32
  }
  func.func @transform_1(%arg0: i32, %arg1: i32) -> (i32, i32) {
    %c0_i32 = arith.constant 0 : i32
    %c0_i32_0 = arith.constant 0 : i32
    return %c0_i32, %arg1 : i32, i32
  }
  func.func @transform_2(%arg0: i32, %arg1: i32) -> (i32, i32) {
    %c0_i32 = arith.constant 0 : i32
    %c0_i32_0 = arith.constant 0 : i32
    %c0_i32_1 = arith.constant 0 : i32
    return %c0_i32, %c0_i32_0 : i32, i32
  }
  func.func @transform_3(%arg0: i32, %arg1: i32) -> (i32, i32, i32) {
    %c0_i32 = arith.constant 0 : i32
    %c0_i32_0 = arith.constant 0 : i32
    %c0_i32_1 = arith.constant 0 : i32
    return %arg0, %c0_i32, %c0_i32_0 : i32, i32, i32
  }
}

</mosaic_0001>

<bundles_post_ra>
// kernel: tpu_custom_call.1
= control target key start
LH: loop header
LB: loop body
LE: loop exit
PB: predicated region body
PF: predicated region fallthrough
CT: control target
= control target key end

     0   :  { %vm61_vm0 = vcmask 261120   ;;  %v574_v2 = vmov 0   ;;  %v22_v13 = vlaneseq  ;;  %v575_v19 = vmov 0.25   ;;  %s704_s0 = inlined_call_operand.vmem [shape: f32[2,32,16], index: 0, kind: input, shape index: {}]   ;;  %s705_s1 = inlined_call_operand.vmem [shape: f32[32,32], index: 1, kind: input, shape index: {}]   ;;  %s706_s2 = inlined_call_operand.vmem [shape: f32[32,1], index: 2, kind: input, shape index: {}]   ;;  %s707_s3 = inlined_call_operand.vmem [shape: f32[2,32,4], index: 3, kind: output, shape index: {}]  }
   0x1   :  { %v40_v0 = vld [vmem:[%s704_s0 + $0x18] sm:$0xff]  ;;  %v39_v1 = vld [vmem:[%s704_s0 + $0x10] sm:$0xff]  ;;  %572 = vset.pattern.permute.xlu0 %v574_v2  ;;  %573 = vset.pattern.permute.xlu1 %v574_v2  ;;  %v605_v3 = vld [vmem:[%s705_s1] sm:$0xff]  ;;  %vm163_vm7 = vcmask 130048   ;;  %vm261_vm8 = vcmask 31744  }
   0x2   :  { %522 = vmatprep.subr.mxu0 %v40_v0  ;;  %v38_v4 = vld [vmem:[%s704_s0 + $0x8] sm:$0xff]  ;;  %530 = vmatprep.mubr.msk.f32.mxu0 %vm61_vm0, %v605_v3  ;;  %v18_v5 = vld [vmem:[%s706_s2] sm:$0xff]  ;;  %v20_v6 = vld [vmem:[%s706_s2 + $0x10] sm:$0xff]  ;;  %v26_v14 = vand.u32 127, %v22_v13  ;;  %v23_v15 = vshrl.u32 %v22_v13, 7 }
   0x3   :  { %523 = vmatpush3.msra.mxu0 %v40_v0  ;;  %43 = vperm.xlu0 %572, %v18_v5   ;;  %v37_v7 = vld [vmem:[%s704_s0] sm:$0xff]  ;;  %v19_v8 = vld [vmem:[%s706_s2 + $0x8] sm:$0xff]  ;;  %v21_v9 = vld [vmem:[%s706_s2 + $0x18] sm:$0xff] }
   0x4   :  { %524 = vmatprep.subr.mxu0 %v39_v1  ;;  %53 = vperm.xlu1 %573, %v20_v6   ;;  %v630_v10 = vld [vmem:[%s705_s1 + $0x8] sm:$0xff]  ;;  %v635_v11 = vld [vmem:[%s705_s1 + $0x10] sm:$0xff]  ;;  %v17_v12 = vld [vmem:[%s705_s1 + $0x18] sm:$0xff]  ;;  %v27_v16 = vmul.u32 4, %v26_v14  ;;  %v24_v17 = vadd.s32 8, %v23_v15 }
   0x5   :  { %525 = vmatpush3.msra.mxu0 %v39_v1  ;;  %v479_v20 = vld [vmem:[%s704_s0 + $0x38] sm:$0xff]  ;;  %v478_v35 = vld [vmem:[%s704_s0 + $0x30] sm:$0xff]  ;;  %v477_v37 = vld [vmem:[%s704_s0 + $0x28] sm:$0xff] }
   0x6   :  { %526 = vmatprep.subr.mxu0 %v38_v4  ;;  %v30_v18 = vadd.s32 4, %v27_v16  ;;  %vm29_vm1 = vcmp.ge.s32.totalorder %v24_v17, %v27_v16  ;;  %vm28_vm4 = vcmp.ge.s32.totalorder %v23_v15, %v27_v16  ;;  %v476_v39 = vld [vmem:[%s704_s0 + $0x20] sm:$0xff] }
   0x7   :  { %527 = vmatpush3.msra.mxu0 %v38_v4  ;;  %48 = vperm.xlu0 %572, %v19_v8  }
   0x8   :  { %528 = vmatprep.subr.mxu0 %v37_v7  ;;  %58 = vperm.xlu1 %573, %v21_v9   ;;  %vm32_vm2 = vcmp.lt.s32.totalorder %v24_v17, %v30_v18  ;;  %vm31_vm5 = vcmp.lt.s32.totalorder %v23_v15, %v30_v18 }
   0x9   :  { %529 = vmatpush3.msra.mxu0 %v37_v7  ;;  %vm34_vm3 = vmand %vm29_vm1, %vm32_vm2 }
   0xa   :  { %531 = vmatmul.mubr.msk.f32.vlgmr.msra.gmra.mxu0 %vm61_vm0, %v630_v10  ;;  %536 = vmatprep.subr.msk.mxu1 %vm34_vm3, %v575_v19  ;;  %vm33_vm6 = vmand %vm28_vm4, %vm31_vm5 }
   0xb   :  { %533 = vmatprep.mubr.msk.f32.mxu0 %vm61_vm0, %v635_v11  ;;  %560 = vmatprep.subr.msk.mxu0 %vm34_vm3, %v575_v19 }
   0xc   :  { %537 = vmatpush3.msk.msra.mxu1 %vm34_vm3, %v575_v19  ;;  %561 = vmatpush3.msk.msra.mxu0 %vm34_vm3, %v575_v19 }
   0xd   :  { %538 = vmatprep.subr.msk.mxu1 %vm33_vm6, %v575_v19  ;;  %562 = vmatprep.subr.msk.mxu0 %vm33_vm6, %v575_v19 }
   0xe   :  { %534 = vmatmul.mubr.msk.f32.gmra.mxu0 %vm61_vm0, %v17_v12  ;;  %539 = vmatpush3.msk.msra.mxu1 %vm33_vm6, %v575_v19 }
   0xf   :  { %563 = vmatpush3.msk.msra.mxu0 %vm33_vm6, %v575_v19  ;;  %546 = vmatprep.subr.mxu1 %v479_v20 }
  0x7e   :  { %v44_v21 = vpop.permute.xlu0 %43 }
  0x7f   :  { %v54_v22 = vpop.permute.xlu1 %53 }
  0x82   :  { %v49_v23 = vpop.permute.xlu0 %48 }
  0x83   :  { %v59_v28 = vpop.permute.xlu1 %58 }
  0xca   :  { %v532_v24 = vpop.f32.mrf.mxu0 }
  0xcb   :  { %v146_v25 = vadd.f32 %v532_v24, %v49_v23 }
  0xcc   :  { %v140_v26 = vpop.f32.mrf.mxu0 }
  0xcd   :  { %v141_v27 = vadd.f32 %v140_v26, %v44_v21  ;;  %v160_v31 = vmax.f32 %v146_v25, 0.0 }
  0xce   :  { %v535_v29 = vpop.f32.mrf.mxu0 }
  0xcf   :  { %v159_v30 = vmax.f32 %v141_v27, 0.0  ;;  %v156_v32 = vadd.f32 %v535_v29, %v59_v28 }
  0xd0   :  { %v150_v33 = vpop.f32.mrf.mxu0 }
  0xd1   :  { %v151_v34 = vadd.f32 %v150_v33, %v54_v22  ;;  %540 = vmatprep.mubr.msk.f32.mxu1 %vm163_vm7, %v159_v30  ;;  %v162_v38 = vmax.f32 %v156_v32, 0.0 }
  0xd2   :  { %541 = vmatmul.mubr.msk.f32.vlgmr.msra.gmra.mxu1 %vm163_vm7, %v160_v31 }
  0xd3   :  { %v161_v36 = vmax.f32 %v151_v34, 0.0  ;;  %547 = vmatpush3.msra.mxu1 %v479_v20 }
  0xd4   :  { %548 = vmatprep.subr.mxu1 %v478_v35 }
  0xd5   :  { %549 = vmatpush3.msra.mxu1 %v478_v35  ;;  %543 = vmatprep.mubr.msk.f32.mxu1 %vm163_vm7, %v161_v36 }
  0xd6   :  { %550 = vmatprep.subr.mxu1 %v477_v37  ;;  %544 = vmatmul.mubr.msk.f32.gmra.mxu1 %vm163_vm7, %v162_v38 }
  0xd7   :  { %551 = vmatpush3.msra.mxu1 %v477_v37  ;;  %554 = vmatprep.mubr.msk.f32.mxu1 %vm61_vm0, %v605_v3 }
  0xd8   :  { %552 = vmatprep.subr.mxu1 %v476_v39 }
  0xd9   :  { %553 = vmatpush3.msra.mxu1 %v476_v39 }
  0xda   :  { %555 = vmatmul.mubr.msk.f32.vlgmr.msra.gmra.mxu1 %vm61_vm0, %v630_v10 }
  0xdb   :  { %557 = vmatprep.mubr.msk.f32.mxu1 %vm61_vm0, %v635_v11 }
  0xde   :  { %558 = vmatmul.mubr.msk.f32.gmra.mxu1 %vm61_vm0, %v17_v12 }
 0x192   :  { %v542_v40 = vpop.f32.mrf.mxu1 }
 0x193   :  { %263 = vst.msk [vmem:[%s707_s3 + $0x8] sm:$0xff] %vm261_vm8, %v542_v40 }
 0x194   :  { %v242_v41 = vpop.f32.mrf.mxu1 }
 0x195   :  { %262 = vst.msk [vmem:[%s707_s3] sm:$0xff] %vm261_vm8, %v242_v41 }
 0x196   :  { %v545_v42 = vpop.f32.mrf.mxu1 }
 0x197   :  { %265 = vst.msk [vmem:[%s707_s3 + $0x18] sm:$0xff] %vm261_vm8, %v545_v42 }
 0x198   :  { %v252_v43 = vpop.f32.mrf.mxu1 }
 0x199   :  { %264 = vst.msk [vmem:[%s707_s3 + $0x10] sm:$0xff] %vm261_vm8, %v252_v43 }
 0x19a   :  { %v556_v44 = vpop.f32.mrf.mxu1 }
 0x19b   :  { %v343_v45 = vadd.f32 %v556_v44, %v49_v23 }
 0x19c   :  { %v337_v46 = vpop.f32.mrf.mxu1 }
 0x19d   :  { %v338_v47 = vadd.f32 %v337_v46, %v44_v21  ;;  %v357_v50 = vmax.f32 %v343_v45, 0.0 }
 0x19e   :  { %v559_v48 = vpop.f32.mrf.mxu1 }
 0x19f   :  { %v356_v49 = vmax.f32 %v338_v47, 0.0  ;;  %v353_v51 = vadd.f32 %v559_v48, %v59_v28 }
 0x1a0   :  { %v347_v52 = vpop.f32.mrf.mxu1 }
 0x1a1   :  { %v348_v53 = vadd.f32 %v347_v52, %v54_v22  ;;  %564 = vmatprep.mubr.msk.f32.mxu0 %vm163_vm7, %v356_v49  ;;  %v359_v55 = vmax.f32 %v353_v51, 0.0 }
 0x1a2   :  { %565 = vmatmul.mubr.msk.f32.vlgmr.msra.gmra.mxu0 %vm163_vm7, %v357_v50 }
 0x1a3   :  { %v358_v54 = vmax.f32 %v348_v53, 0.0 }
 0x1a5   :  { %567 = vmatprep.mubr.msk.f32.mxu0 %vm163_vm7, %v358_v54 }
 0x1a6   :  { %568 = vmatmul.mubr.msk.f32.gmra.mxu0 %vm163_vm7, %v359_v55 }
 0x262   :  { %v566_v56 = vpop.f32.mrf.mxu0 }
 0x263   :  { %491 = vst.msk [vmem:[%s707_s3 + $0x28] sm:$0xff] %vm261_vm8, %v566_v56 }
 0x264   :  { %v438_v57 = vpop.f32.mrf.mxu0 }
 0x265   :  { %490 = vst.msk [vmem:[%s707_s3 + $0x20] sm:$0xff] %vm261_vm8, %v438_v57 }
 0x266   :  { %v569_v58 = vpop.f32.mrf.mxu0 }
 0x267   :  { %493 = vst.msk [vmem:[%s707_s3 + $0x38] sm:$0xff] %vm261_vm8, %v569_v58 }
 0x268   :  { %v448_v59 = vpop.f32.mrf.mxu0 }
 0x269   :  { %492 = vst.msk [vmem:[%s707_s3 + $0x30] sm:$0xff] %vm261_vm8, %v448_v59 }

</bundles_post_ra>
